<compile_context>
chip_gen: v7x
topology: tpu7x:2x2x1
jax: 0.10.0
libtpu: 0.0.40
codegen_flags: <defaults>
</compile_context>

<pallas_src>
import functools

import jax
import jax.numpy as jnp
from jax.experimental import pallas as pl
from jax.experimental.pallas import tpu as pltpu

H1, H2 = 128, 256  # hidden widths of the Critic


def critic_kernel(x_ref, w1_ref, b1_ref, w2_ref, b2_ref, w3_ref, b3_ref, o_ref):
    # layer 1: (TB,S)bf16 @ (S,128)bf16 -> f32 acc, bias+ReLU in f32
    h1 = jnp.dot(x_ref[...], w1_ref[...], preferred_element_type=jnp.float32)
    h1 = jnp.maximum(h1 + b1_ref[...], 0.0)
    # layer 2: (TB,128)bf16 @ (128,256)bf16 -> f32 acc, bias+ReLU in f32
    h2 = jnp.dot(h1.astype(jnp.bfloat16), w2_ref[...],
                 preferred_element_type=jnp.float32)
    h2 = jnp.maximum(h2 + b2_ref[...], 0.0)
    # layer 3 (value head, N=1): VPU multiply + lane reduce, not a 1-wide MXU matmul
    v = jnp.sum(h2 * w3_ref[...], axis=-1, keepdims=True)
    o_ref[...] = v + b3_ref[0, 0]  # b3 is a scalar in SMEM


@functools.partial(jax.jit, static_argnames=("tb_max",))
def critic_forward(state, params, *, tb_max=1024):
    """state: (B, S) f32. params: w1 (S,128), b1 (1,128), w2 (128,256), b2 (1,256),
    w3 (1,256), b3 (1,1). Returns (B, 1) f32 values."""
    B, S = state.shape

    x = state.astype(jnp.bfloat16)
    w1 = params["w1"].astype(jnp.bfloat16)
    w2 = params["w2"].astype(jnp.bfloat16)
    b1, b2 = params["b1"], params["b2"]
    w3 = params["w3"]                 # (1, H2) f32 — VPU path, stays resident
    b3 = params["b3"].reshape(1, 1)   # scalar, goes to SMEM

    # --- batch tiling: TB rows per grid step (multiple of 8 sublanes) ---
    assert tb_max % 8 == 0
    b_pad = -(-B // 8) * 8
    if b_pad <= tb_max:
        tb = b_pad
    else:
        tb = tb_max
        b_pad = -(-B // tb) * tb
    if b_pad != B:
        x = jnp.pad(x, ((0, b_pad - B), (0, 0)))
    grid = (b_pad // tb,)

    def resident(shape):  # weights/biases: same block every grid step -> VMEM-resident
        return pl.BlockSpec(shape, lambda i: (0, 0))

    flops = 2 * B * (S * H1 + H1 * H2 + H2)
    bytes_accessed = (x.size * 2 + w1.size * 2 + w2.size * 2
                      + (b1.size + b2.size + w3.size + 1) * 4 + b_pad * 4)

    out = pl.pallas_call(
        critic_kernel,
        out_shape=jax.ShapeDtypeStruct((b_pad, 1), jnp.float32),
        grid=grid,
        in_specs=[
            pl.BlockSpec((tb, S), lambda i: (i, 0)),            # x: streamed batch tile
            resident((S, H1)),                                  # w1
            resident((1, H1)),                                  # b1
            resident((H1, H2)),                                 # w2
            resident((1, H2)),                                  # b2
            resident((1, H2)),                                  # w3 (value-head row)
            pl.BlockSpec(memory_space=pltpu.MemorySpace.SMEM),  # b3 scalar
        ],
        out_specs=pl.BlockSpec((tb, 1), lambda i: (i, 0)),
        compiler_params=pltpu.CompilerParams(
            dimension_semantics=("parallel",),      # shard batch steps across TCs (v7x)
            vmem_limit_bytes=32 * 1024 * 1024,      # headroom on v5e; fine on v6e/v7x
        ),
        cost_estimate=pl.CostEstimate(
            flops=flops, transcendentals=0, bytes_accessed=bytes_accessed),
    )(x, w1, b1, w2, b2, w3, b3)

    return out[:B]


def init_params(key, state_size):
    """Deterministic init mimicking PyTorch nn.Linear default U[-1/sqrt(fan_in), +...].
    Weights stored as (in, out); value head w3 stored as its (1, 256) row."""
    def linear(key, fan_in, fan_out):
        kw, kb = jax.random.split(key)
        bound = 1.0 / jnp.sqrt(fan_in)
        w = jax.random.uniform(kw, (fan_in, fan_out), jnp.float32, -bound, bound)
        b = jax.random.uniform(kb, (1, fan_out), jnp.float32, -bound, bound)
        return w, b

    k1, k2, k3 = jax.random.split(key, 3)
    w1, b1 = linear(k1, state_size, H1)
    w2, b2 = linear(k2, H1, H2)
    w3, b3 = linear(k3, H2, 1)
    return dict(w1=w1, b1=b1, w2=w2, b2=b2, w3=w3.T, b3=b3)  # w3 -> (1, 256)


def critic_reference(state, params):
    h1 = jnp.maximum(state @ params["w1"] + params["b1"], 0.0)
    h2 = jnp.maximum(h1 @ params["w2"] + params["b2"], 0.0)
    return h2 @ params["w3"].T + params["b3"]


if __name__ == "__main__":
    key = jax.random.PRNGKey(0)
    k_params, k_state1, k_state2 = jax.random.split(key, 3)

    B, STATE_SIZE, ACTION_SIZE = 8, 8, 4  # action_size unused by Critic.forward
    params = init_params(k_params, STATE_SIZE)
    state = jax.random.normal(k_state1, (B, STATE_SIZE), jnp.float32)

    value = jax.block_until_ready(critic_forward(state, params))
    ref = critic_reference(state, params)
    assert value.shape == (B, 1), value.shape
    # bf16 matmul inputs with f32 accumulation -> compare to f32 reference loosely
    assert jnp.allclose(value, ref, atol=5e-2, rtol=5e-2), (value, ref)

    # exercise the multi-step batch grid + padding path
    B2 = 300
    state2 = jax.random.normal(k_state2, (B2, STATE_SIZE), jnp.float32)
    value2 = jax.block_until_ready(critic_forward(state2, params, tb_max=128))
    ref2 = critic_reference(state2, params)
    assert value2.shape == (B2, 1), value2.shape
    assert jnp.allclose(value2, ref2, atol=5e-2, rtol=5e-2)

    print("KERNEL_OK")
</pallas_src>

<mosaic_0001>
module attributes {stable_mosaic.version = 11 : i64} {
  func.func @critic_kernel(%arg0: i32, %arg1: memref<8x8xbf16, #tpu.memory_space<vmem>>, %arg2: memref<8x128xbf16, #tpu.memory_space<vmem>>, %arg3: memref<1x128xf32, #tpu.memory_space<vmem>>, %arg4: memref<128x256xbf16, #tpu.memory_space<vmem>>, %arg5: memref<1x256xf32, #tpu.memory_space<vmem>>, %arg6: memref<1x256xf32, #tpu.memory_space<vmem>>, %arg7: memref<1x1xf32, #tpu.memory_space<smem>>, %arg8: memref<8x1xf32, #tpu.memory_space<vmem>>) attributes {dimension_semantics = [#tpu.dimension_semantics<parallel>], iteration_bounds = array<i64: 1>, scalar_prefetch = 0 : i64, scratch_operands = 0 : i64, tpu.core_type = #tpu.core_type<tc>, window_params = [{transform_indices = @transform_0, window_bounds = array<i64: 8, 8>}, {pipeline_mode = #tpu.pipeline_mode<synchronous>, transform_indices = @transform_1, window_bounds = array<i64: 8, 128>}, {pipeline_mode = #tpu.pipeline_mode<synchronous>, transform_indices = @transform_2, window_bounds = array<i64: 1, 128>}, {pipeline_mode = #tpu.pipeline_mode<synchronous>, transform_indices = @transform_3, window_bounds = array<i64: 128, 256>}, {pipeline_mode = #tpu.pipeline_mode<synchronous>, transform_indices = @transform_4, window_bounds = array<i64: 1, 256>}, {pipeline_mode = #tpu.pipeline_mode<synchronous>, transform_indices = @transform_5, window_bounds = array<i64: 1, 256>}, {transform_indices = @transform_6, window_bounds = array<i64: 1, 1>}, {transform_indices = @transform_7, window_bounds = array<i64: 8, 1>}]} {
    %c0 = arith.constant 0 : index
    %c0_0 = arith.constant 0 : index
    %0 = vector.load %arg1[%c0, %c0_0] : memref<8x8xbf16, #tpu.memory_space<vmem>>, vector<8x8xbf16>
    %c0_1 = arith.constant 0 : index
    %c0_2 = arith.constant 0 : index
    %1 = vector.load %arg2[%c0_1, %c0_2] : memref<8x128xbf16, #tpu.memory_space<vmem>>, vector<8x128xbf16>
    %cst = arith.constant dense<0.000000e+00> : vector<8x128xf32>
    %2 = tpu.matmul %0, %1, %cst {dimension_numbers = #tpu.dot_dimension_numbers<[1], [0], [0], [1], [0, 0, 1, 1], [], []>} : vector<8x8xbf16>, vector<8x128xbf16>, vector<8x128xf32> -> vector<8x128xf32>
    %c0_3 = arith.constant 0 : index
    %c0_4 = arith.constant 0 : index
    %3 = vector.load %arg3[%c0_3, %c0_4] : memref<1x128xf32, #tpu.memory_space<vmem>>, vector<1x128xf32>
    %4 = vector.broadcast %3 : vector<1x128xf32> to vector<8x128xf32>
    %5 = arith.addf %2, %4 : vector<8x128xf32>
    %cst_5 = arith.constant 0.000000e+00 : f32
    %6 = vector.broadcast %cst_5 : f32 to vector<8x128xf32>
    %7 = arith.maximumf %5, %6 : vector<8x128xf32>
    %8 = arith.truncf %7 : vector<8x128xf32> to vector<8x128xbf16>
    %c0_6 = arith.constant 0 : index
    %c0_7 = arith.constant 0 : index
    %9 = vector.load %arg4[%c0_6, %c0_7] : memref<128x256xbf16, #tpu.memory_space<vmem>>, vector<128x256xbf16>
    %cst_8 = arith.constant dense<0.000000e+00> : vector<8x256xf32>
    %10 = tpu.matmul %8, %9, %cst_8 {dimension_numbers = #tpu.dot_dimension_numbers<[1], [0], [0], [1], [0, 0, 1, 1], [], []>} : vector<8x128xbf16>, vector<128x256xbf16>, vector<8x256xf32> -> vector<8x256xf32>
    %c0_9 = arith.constant 0 : index
    %c0_10 = arith.constant 0 : index
    %11 = vector.load %arg5[%c0_9, %c0_10] : memref<1x256xf32, #tpu.memory_space<vmem>>, vector<1x256xf32>
    %12 = vector.broadcast %11 : vector<1x256xf32> to vector<8x256xf32>
    %13 = arith.addf %10, %12 : vector<8x256xf32>
    %cst_11 = arith.constant 0.000000e+00 : f32
    %14 = vector.broadcast %cst_11 : f32 to vector<8x256xf32>
    %15 = arith.maximumf %13, %14 : vector<8x256xf32>
    %c0_12 = arith.constant 0 : index
    %c0_13 = arith.constant 0 : index
    %16 = vector.load %arg6[%c0_12, %c0_13] : memref<1x256xf32, #tpu.memory_space<vmem>>, vector<1x256xf32>
    %17 = vector.broadcast %16 : vector<1x256xf32> to vector<8x256xf32>
    %18 = arith.mulf %15, %17 : vector<8x256xf32>
    %cst_14 = arith.constant dense<0.000000e+00> : vector<8xf32>
    %19 = vector.multi_reduction <add>, %18, %cst_14 [1] : vector<8x256xf32> to vector<8xf32>
    %20 = vector.shape_cast %19 : vector<8xf32> to vector<8x1xf32>
    %c0_15 = arith.constant 0 : index
    %c0_16 = arith.constant 0 : index
    %21 = memref.load %arg7[%c0_15, %c0_16] : memref<1x1xf32, #tpu.memory_space<smem>>
    %22 = vector.broadcast %21 : f32 to vector<8x1xf32>
    %23 = arith.addf %20, %22 : vector<8x1xf32>
    %c0_17 = arith.constant 0 : index
    %c0_18 = arith.constant 0 : index
    %24 = vector.load %arg8[%c0_17, %c0_18] : memref<8x1xf32, #tpu.memory_space<vmem>>, vector<8x1xf32>
    tpu.vector_store %arg8[%c0_17, %c0_18], %23 {strides = array<i32>} : memref<8x1xf32, #tpu.memory_space<vmem>>, vector<8x1xf32>,
    return
  }
  func.func @transform_0(%arg0: i32) -> (i32, i32) {
    %c0_i32 = arith.constant 0 : i32
    %c0_i32_0 = arith.constant 0 : i32
    return %arg0, %c0_i32 : i32, i32
  }
  func.func @transform_1(%arg0: i32) -> (i32, i32) {
    %c0_i32 = arith.constant 0 : i32
    %c0_i32_0 = arith.constant 0 : i32
    %c0_i32_1 = arith.constant 0 : i32
    return %c0_i32, %c0_i32_0 : i32, i32
  }
  func.func @transform_2(%arg0: i32) -> (i32, i32) {
    %c0_i32 = arith.constant 0 : i32
    %c0_i32_0 = arith.constant 0 : i32
    %c0_i32_1 = arith.constant 0 : i32
    return %c0_i32, %c0_i32_0 : i32, i32
  }
  func.func @transform_3(%arg0: i32) -> (i32, i32) {
    %c0_i32 = arith.constant 0 : i32
    %c0_i32_0 = arith.constant 0 : i32
    %c0_i32_1 = arith.constant 0 : i32
    return %c0_i32, %c0_i32_0 : i32, i32
  }
  func.func @transform_4(%arg0: i32) -> (i32, i32) {
    %c0_i32 = arith.constant 0 : i32
    %c0_i32_0 = arith.constant 0 : i32
    %c0_i32_1 = arith.constant 0 : i32
    return %c0_i32, %c0_i32_0 : i32, i32
  }
  func.func @transform_5(%arg0: i32) -> (i32, i32) {
    %c0_i32 = arith.constant 0 : i32
    %c0_i32_0 = arith.constant 0 : i32
    %c0_i32_1 = arith.constant 0 : i32
    return %c0_i32, %c0_i32_0 : i32, i32
  }
  func.func @transform_6(%arg0: i32) -> (i32, i32) {
    %c0_i32 = arith.constant 0 : i32
    %c0_i32_0 = arith.constant 0 : i32
    %c0_i32_1 = arith.constant 0 : i32
    return %c0_i32, %c0_i32_0 : i32, i32
  }
  func.func @transform_7(%arg0: i32) -> (i32, i32) {
    %c0_i32 = arith.constant 0 : i32
    %c0_i32_0 = arith.constant 0 : i32
    return %arg0, %c0_i32 : i32, i32
  }
}

</mosaic_0001>

<bundles_post_ra>
// kernel: critic_forward.1
= control target key start
LH: loop header
LB: loop body
LE: loop exit
PB: predicated region body
PF: predicated region fallthrough
CT: control target
= control target key end

     0   :  { %vm41_vm0 = vcmask 1043456   ;;  %v317_v0 = vmov 0.0   ;;  %vm318_vm1 = vmmov 0   ;;  %vm37_vm2 = vcmask 64512   ;;  %s429_s1 = inlined_call_operand.vmem [shape: bf16[8,128], index: 1, kind: input, shape index: {}]   ;;  %s430_s0 = inlined_call_operand.vmem [shape: bf16[8,8], index: 0, kind: input, shape index: {}]   ;;  %s431_s3 = inlined_call_operand.vmem [shape: bf16[128,256], index: 3, kind: input, shape index: {}]   ;;  %s432_s2 = inlined_call_operand.vmem [shape: f32[1,128], index: 2, kind: input, shape index: {}]   ;;  %s433_s4 = inlined_call_operand.vmem [shape: f32[1,256], index: 4, kind: input, shape index: {}]   ;;  %s434_s5 = inlined_call_operand.vmem [shape: f32[1,256], index: 5, kind: input, shape index: {}]   ;;  %s435_s6 = inlined_call_operand.<no memory space> [shape: f32[1,1], index: 6, kind: input, shape index: {}]   ;;  %s436_s7 = inlined_call_operand.vmem [shape: f32[8,1], index: 7, kind: output, shape index: {}]  }
   0x1   :  { %284 = vmatprep.subr.bf16.mxu0 %v317_v0  ;;  %v29_v1 = vld [vmem:[%s429_s1] sm:$0xf]  ;;  %286 = vmatprep.mubr.msk.bf16.mxu0 %vm318_vm1, %v317_v0  ;;  %v293_v4 = vld [vmem:[%s431_s3 + $0x4] ss:$8 sps:$4 sm:$0xff]   ;;  %v296_v6 = vld [vmem:[%s431_s3 + $0x14] ss:$8 sps:$4 sm:$0xff]   ;;  %v105_v29 = vlaneseq  ;;  %v256_v50 = vstv %s435_s6 }
   0x2   :  { %v28_v2 = vld [vmem:[%s430_s0] sm:$0xf]  ;;  %v43_v3 = vsel %vm41_vm0, %v29_v1, 0  ;;  %195 = vmatprep.subr.bf16.mxu1 %v293_v4  ;;  %v298_v7 = vld [vmem:[%s431_s3 + $0x10] ss:$8 sps:$4 sm:$0xff]   ;;  %v319_v20 = vmov 0  }
   0x3   :  { %v295_v5 = vld [vmem:[%s431_s3] ss:$8 sps:$4 sm:$0xff]   ;;  %285 = vmatpush3.bf16.msra.mxu0 %v43_v3  ;;  %v299_v8 = vld [vmem:[%s431_s3 + $0x24] ss:$8 sps:$4 sm:$0xff]   ;;  %v302_v10 = vld [vmem:[%s431_s3 + $0x34] ss:$8 sps:$4 sm:$0xff]   ;;  %227 = vmatprep.mubr.bf16.mxu1 %v319_v20 }
   0x4   :  { %196 = vmatpush1.bf16.msra.mxu1 %v295_v5  ;;  %v301_v9 = vld [vmem:[%s431_s3 + $0x20] ss:$8 sps:$4 sm:$0xff]   ;;  %v304_v11 = vld [vmem:[%s431_s3 + $0x30] ss:$8 sps:$4 sm:$0xff]   ;;  %v305_v12 = vld [vmem:[%s431_s3 + $0x44] ss:$8 sps:$4 sm:$0xff]  }
   0x5   :  { %197 = vmatprep.subr.bf16.mxu1 %v296_v6  ;;  %v307_v13 = vld [vmem:[%s431_s3 + $0x40] ss:$8 sps:$4 sm:$0xff]   ;;  %v308_v14 = vld [vmem:[%s431_s3 + $0x54] ss:$8 sps:$4 sm:$0xff]   ;;  %v310_v15 = vld [vmem:[%s431_s3 + $0x50] ss:$8 sps:$4 sm:$0xff]  }
   0x6   :  { %287 = vmatmul.mubr.msk.bf16.vlgmr.msra.gmra.mrb[0].mxu0 %vm37_vm2, %v28_v2  ;;  %v311_v16 = vld [vmem:[%s431_s3 + $0x64] ss:$8 sps:$4 sm:$0xff]   ;;  %v313_v17 = vld [vmem:[%s431_s3 + $0x60] ss:$8 sps:$4 sm:$0xff]   ;;  %v314_v18 = vld [vmem:[%s431_s3 + $0x74] ss:$8 sps:$4 sm:$0xff]  }
   0x7   :  { %v316_v19 = vld [vmem:[%s431_s3 + $0x70] ss:$8 sps:$4 sm:$0xff]   ;;  %v264_v21 = vld [vmem:[%s432_s2] ss:$0 sm:$0xff]  ;;  %v106_v30 = vshrl.u32 %v105_v29, 7  ;;  %vm258_vm3 = vcmask 7168  }
   0x8   :  { %198 = vmatpush1.bf16.msra.mxu1 %v298_v7  ;;  %v103_v32 = vld [vmem:[%s433_s4] sm:$0x3] }
   0x9   :  { %199 = vmatprep.subr.bf16.mxu1 %v299_v8  ;;  %v107_v31 = vsub.s32 0, %v106_v30  ;;  %v111_v33 = vsub.s32 1, %v106_v30  ;;  %v238_v36 = vld [vmem:[%s434_s5] sm:$0x3] }
   0xb   :  { %v108_v34 = vrot.slane %v103_v32, %v107_v31  ;;  %v112_v35 = vrot.slane %v103_v32, %v111_v33  ;;  %v243_v40 = vrot.slane %v238_v36, %v107_v31  ;;  %v247_v43 = vrot.slane %v238_v36, %v111_v33 }
   0xc   :  { %200 = vmatpush1.bf16.msra.mxu1 %v301_v9 }
   0xd   :  { %201 = vmatprep.subr.bf16.mxu1 %v302_v10 }
  0x10   :  { %202 = vmatpush1.bf16.msra.mxu1 %v304_v11 }
  0x11   :  { %203 = vmatprep.subr.bf16.mxu1 %v305_v12 }
  0x14   :  { %204 = vmatpush1.bf16.msra.mxu1 %v307_v13 }
  0x15   :  { %205 = vmatprep.subr.bf16.mxu1 %v308_v14 }
  0x18   :  { %206 = vmatpush1.bf16.msra.mxu1 %v310_v15 }
  0x19   :  { %207 = vmatprep.subr.bf16.mxu1 %v311_v16 }
  0x1c   :  { %208 = vmatpush1.bf16.msra.mxu1 %v313_v17 }
  0x1d   :  { %209 = vmatprep.subr.bf16.mxu1 %v314_v18 }
  0x20   :  { %210 = vmatpush1.bf16.msra.mxu1 %v316_v19 }
  0xd9   :  { %v79_v22 = vpop.f32.mrb[0].mxu0 }
  0xda   :  { %v80_v23 = vadd.f32 %v264_v21, %v79_v22  ;;  %v288_v24 = vpop.f32.mrb[1].mxu0 }
  0xdb   :  { %v82_v25 = vpop.f32.mrb[2].mxu0 }
  0xdc   :  { %v85_v26 = vmax.f32 %v80_v23, 0.0  ;;  %v289_v27 = vpop.f32.mrb[3].mxu0 }
  0xde   :  { %v86_v28 = vpack.c.bf16 %v85_v26, %v85_v26 }
  0xe0   :  { %228 = vmatmul.mubr.bf16.vlgmr.msra.gmra.mrb[0].mxu1 %v86_v28 }
 0x1b3   :  { %v229_v37 = vpop.f32.mrb[0].mxu1 }
 0x1b4   :  { %v230_v38 = vadd.f32 %v229_v37, %v108_v34  ;;  %v231_v39 = vpop.f32.mrb[1].mxu1 }
 0x1b5   :  { %v232_v41 = vadd.f32 %v231_v39, %v112_v35  ;;  %v233_v42 = vpop.f32.mrb[2].mxu1 }
 0x1b6   :  { %v236_v44 = vmax.f32 %v230_v38, 0.0  ;;  %v234_v45 = vpop.f32.mrb[3].mxu1 }
 0x1b7   :  { %v237_v46 = vmax.f32 %v232_v41, 0.0 }
 0x1b8   :  { %v250_v47 = vmul.f32 %v243_v40, %v236_v44 }
 0x1b9   :  { %v251_v48 = vmul.f32 %v247_v43, %v237_v46 }
 0x1bb   :  { %v252_v49 = vadd.f32 %v251_v48, %v250_v47 }
 0x1bd   :  { %253 = vadd.xlane.f32.xlu0 %v252_v49 }
 0x24a   :  { %v254_v51 = vpop.xlane.xlu0 %253 }
 0x24b   :  { %v257_v52 = vadd.f32 %v256_v50, %v254_v51 }
 0x24d   :  { %259 = vst.msk [vmem:[%s436_s7] sm:$0xff] %vm258_vm3, %v257_v52 }

</bundles_post_ra>
